<compile_context>
chip_gen: v7x
topology: tpu7x:2x2x1
jax: 0.10.0
libtpu: 0.0.40
codegen_flags: <defaults>
</compile_context>

<pallas_src>
import math
import functools

import jax
import jax.numpy as jnp
from jax.experimental import pallas as pl
from jax.experimental.pallas import tpu as pltpu  # noqa: F401  (TPU backend assumed)

F32 = jnp.float32


# ----------------------------- fused kernel -----------------------------

def _hier_attn_kernel(x_ref, wqkv_ref, wout_ref, o_ref, *, B, S, H, Dh):
    Din = x_ref.shape[-1]
    E = H * Dh
    BS = B * S

    x = x_ref[...]                          # [BS, Din]            (f32)
    wqkv = wqkv_ref[...]                    # [Din+1, 3E], last row = fused qkv bias
    wout = wout_ref[...]                    # [E+1,  Din], last row = output bias

    # ---- fused QKV projection: one wide bf16 MXU pass, f32 accumulate ----
    qkv = jnp.dot(x.astype(jnp.bfloat16),
                  wqkv[:Din, :].astype(jnp.bfloat16),
                  preferred_element_type=jnp.float32)             # [BS, 3E]
    qkv = qkv + wqkv[Din:Din + 1, :]        # bias row, broadcast over BS rows

    # ---- single head-major relayout: [BS, 3E] -> [B, 3H, S, Dh] ----
    qkv_hm = qkv.reshape(B, S, 3 * H, Dh).transpose(0, 2, 1, 3)
    q = qkv_hm[:, 0:H].reshape(B * H, S, Dh)        # scale already folded into Wq/bq
    k = qkv_hm[:, H:2 * H].reshape(B * H, S, Dh)
    v = qkv_hm[:, 2 * H:3 * H].reshape(B * H, S, Dh)

    # ---- batched attention over (B*H): scores + f32 softmax + context ----
    s = jnp.einsum('bqd,bkd->bqk',
                   q.astype(jnp.bfloat16), k.astype(jnp.bfloat16),
                   preferred_element_type=jnp.float32)            # [B*H, S, S]
    s = s - jnp.max(s, axis=-1, keepdims=True)
    p = jnp.exp(s)
    p = p * pl.reciprocal(jnp.sum(p, axis=-1, keepdims=True), approx=False)
    # TODO(synk): nn.Dropout on attention weights is eval-mode identity here;
    # training parity would need pltpu.prng_seed / prng_random_bits masking.
    ctx = jnp.einsum('bqk,bkd->bqd',
                     p.astype(jnp.bfloat16), v.astype(jnp.bfloat16),
                     preferred_element_type=jnp.float32)          # [B*H, S, Dh]

    # ---- re-assemble all heads and do ONE output-projection matmul ----
    ctx2 = ctx.reshape(B, H, S, Dh).transpose(0, 2, 1, 3).reshape(BS, E)
    out = jnp.dot(ctx2.astype(jnp.bfloat16),
                  wout[:E, :].astype(jnp.bfloat16),
                  preferred_element_type=jnp.float32)             # [BS, Din]
    out = out + wout[E:E + 1, :]
    o_ref[...] = out.astype(o_ref.dtype)


def hierarchical_attention(x, w_qkv_aug, w_out_aug, *, num_heads, head_dim):
    """x: [B, S, Din]; w_qkv_aug: [Din+1, 3*H*Dh]; w_out_aug: [H*Dh+1, Din]."""
    B, S, Din = x.shape
    kernel = functools.partial(_hier_attn_kernel, B=B, S=S, H=num_heads, Dh=head_dim)
    # Whole-array VMEM blocks, no grid: everything fits in VMEM with huge margin.
    out2 = pl.pallas_call(
        kernel,
        out_shape=jax.ShapeDtypeStruct((B * S, Din), x.dtype),
    )(x.reshape(B * S, Din), w_qkv_aug, w_out_aug)
    return out2.reshape(B, S, Din)


# ----------------------- host-side parameter packing -----------------------

def pack_params(w_q, b_q, w_k, b_k, w_v, b_v, w_out, b_out, *, head_dim):
    """One-time host-side fusion: fold the softmax scale into the Q columns and
    append the biases as an extra weight row (3 kernel inputs instead of 5)."""
    scale = 1.0 / math.sqrt(head_dim)
    w_qkv = jnp.concatenate([w_q * scale, w_k, w_v], axis=1)        # [Din, 3E]
    b_qkv = jnp.concatenate([b_q * scale, b_k, b_v], axis=0)        # [3E]
    w_qkv_aug = jnp.concatenate([w_qkv, b_qkv[None, :]], axis=0)    # [Din+1, 3E]
    w_out_aug = jnp.concatenate([w_out, b_out[None, :]], axis=0)    # [E+1, Din]
    return w_qkv_aug, w_out_aug


# ----------------------------- pure-JAX reference -----------------------------

def hierarchical_attention_ref(x, w_q, b_q, w_k, b_k, w_v, b_v, w_out, b_out,
                               *, num_heads, head_dim):
    B, S, _ = x.shape

    def split(t):
        return t.reshape(B, S, num_heads, head_dim).transpose(0, 2, 1, 3)

    q = split(x @ w_q + b_q)
    k = split(x @ w_k + b_k)
    v = split(x @ w_v + b_v)
    s = jnp.einsum('bhqd,bhkd->bhqk', q, k) / math.sqrt(head_dim)
    p = jax.nn.softmax(s, axis=-1)
    ctx = jnp.einsum('bhqk,bhkd->bhqd', p, v)
    ctx = ctx.transpose(0, 2, 1, 3).reshape(B, S, num_heads * head_dim)
    return ctx @ w_out + b_out


# ----------------------------- main -----------------------------

if __name__ == "__main__":
    # Shapes implied by the module: x is [batch, seq_len, input_dim];
    # `hidden_dim` is the per-head dim; projections are input_dim -> hidden_dim*num_heads.
    B, S = 2, 8
    input_dim = 32
    hidden_dim = 16          # per-head dim (PyTorch module's `hidden_dim`)
    num_heads = 4
    E = hidden_dim * num_heads

    key = jax.random.PRNGKey(0)
    (kx, kwq, kwk, kwv, kbq, kbk, kbv, kwo, kbo) = jax.random.split(key, 9)

    def uinit(k, shape, fan_in):
        bound = 1.0 / math.sqrt(fan_in)
        return jax.random.uniform(k, shape, F32, -bound, bound)

    # nn.Linear-style params, stored transposed ([in, out]) for channels-last matmul.
    w_q = uinit(kwq, (input_dim, E), input_dim)
    w_k = uinit(kwk, (input_dim, E), input_dim)
    w_v = uinit(kwv, (input_dim, E), input_dim)
    b_q = uinit(kbq, (E,), input_dim)
    b_k = uinit(kbk, (E,), input_dim)
    b_v = uinit(kbv, (E,), input_dim)
    w_out = uinit(kwo, (E, input_dim), E)
    b_out = uinit(kbo, (input_dim,), E)

    w_qkv_aug, w_out_aug = pack_params(w_q, b_q, w_k, b_k, w_v, b_v, w_out, b_out,
                                       head_dim=hidden_dim)

    x = jax.random.normal(kx, (B, S, input_dim), F32)

    out = hierarchical_attention(x, w_qkv_aug, w_out_aug,
                                 num_heads=num_heads, head_dim=hidden_dim)
    out = jax.block_until_ready(out)

    ref = hierarchical_attention_ref(x, w_q, b_q, w_k, b_k, w_v, b_v, w_out, b_out,
                                     num_heads=num_heads, head_dim=hidden_dim)

    assert out.shape == (B, S, input_dim)
    assert bool(jnp.all(jnp.isfinite(out)))
    # bf16 MXU operands (f32 accumulate / f32 softmax) -> slightly looser tolerance.
    max_err = float(jnp.max(jnp.abs(out - ref)))
    assert max_err < 2e-2, f"max abs err vs reference: {max_err}"
    print("KERNEL_OK")
</pallas_src>

<mosaic_0001>
module attributes {stable_mosaic.version = 11 : i64} {
  func.func @_hier_attn_kernel(%arg0: memref<16x32xf32, #tpu.memory_space<vmem>>, %arg1: memref<33x192xf32, #tpu.memory_space<vmem>>, %arg2: memref<65x32xf32, #tpu.memory_space<vmem>>, %arg3: memref<16x32xf32, #tpu.memory_space<vmem>>) attributes {dimension_semantics = [], scalar_prefetch = 0 : i64, scratch_operands = 0 : i64, tpu.core_type = #tpu.core_type<tc>} {
    %c0 = arith.constant 0 : index
    %c0_0 = arith.constant 0 : index
    %0 = vector.load %arg0[%c0, %c0_0] : memref<16x32xf32, #tpu.memory_space<vmem>>, vector<16x32xf32>
    %c0_1 = arith.constant 0 : index
    %c0_2 = arith.constant 0 : index
    %1 = vector.load %arg1[%c0_1, %c0_2] : memref<33x192xf32, #tpu.memory_space<vmem>>, vector<33x192xf32>
    %c0_3 = arith.constant 0 : index
    %c0_4 = arith.constant 0 : index
    %2 = vector.load %arg2[%c0_3, %c0_4] : memref<65x32xf32, #tpu.memory_space<vmem>>, vector<65x32xf32>
    %3 = arith.truncf %0 : vector<16x32xf32> to vector<16x32xbf16>
    %4 = vector.extract_strided_slice %1 {offsets = [0, 0], sizes = [32, 192], strides = [1, 1]} : vector<33x192xf32> to vector<32x192xf32>
    %5 = arith.truncf %4 : vector<32x192xf32> to vector<32x192xbf16>
    %cst = arith.constant dense<0.000000e+00> : vector<16x192xf32>
    %6 = tpu.matmul %3, %5, %cst {dimension_numbers = #tpu.dot_dimension_numbers<[1], [0], [0], [1], [0, 0, 1, 1], [], []>} : vector<16x32xbf16>, vector<32x192xbf16>, vector<16x192xf32> -> vector<16x192xf32>
    %7 = vector.extract_strided_slice %1 {offsets = [32, 0], sizes = [1, 192], strides = [1, 1]} : vector<33x192xf32> to vector<1x192xf32>
    %8 = vector.broadcast %7 : vector<1x192xf32> to vector<16x192xf32>
    %9 = arith.addf %6, %8 : vector<16x192xf32>
    %10 = vector.shape_cast %9 : vector<16x192xf32> to vector<2x8x12x16xf32>
    %11 = tpu.transpose %10, [0, 2, 1, 3] : vector<2x8x12x16xf32> -> vector<2x12x8x16xf32>
    %12 = vector.extract_strided_slice %11 {offsets = [0, 0, 0, 0], sizes = [2, 4, 8, 16], strides = [1, 1, 1, 1]} : vector<2x12x8x16xf32> to vector<2x4x8x16xf32>
    %13 = vector.shape_cast %12 : vector<2x4x8x16xf32> to vector<8x8x16xf32>
    %14 = vector.extract_strided_slice %11 {offsets = [0, 4, 0, 0], sizes = [2, 4, 8, 16], strides = [1, 1, 1, 1]} : vector<2x12x8x16xf32> to vector<2x4x8x16xf32>
    %15 = vector.shape_cast %14 : vector<2x4x8x16xf32> to vector<8x8x16xf32>
    %16 = vector.extract_strided_slice %11 {offsets = [0, 8, 0, 0], sizes = [2, 4, 8, 16], strides = [1, 1, 1, 1]} : vector<2x12x8x16xf32> to vector<2x4x8x16xf32>
    %17 = vector.shape_cast %16 : vector<2x4x8x16xf32> to vector<8x8x16xf32>
    %18 = arith.truncf %13 : vector<8x8x16xf32> to vector<8x8x16xbf16>
    %19 = arith.truncf %15 : vector<8x8x16xf32> to vector<8x8x16xbf16>
    "tpu.trace_start"() <{level = 10 : i32, message = "bqd,bkd->bqk"}> : () -> ()
    %cst_5 = arith.constant dense<0.000000e+00> : vector<8x8x8xf32>
    %20 = tpu.matmul %18, %19, %cst_5 {dimension_numbers = #tpu.dot_dimension_numbers<[2], [2], [1], [1], [0, 0, 0, 1, 1, 1], [0], [0]>} : vector<8x8x16xbf16>, vector<8x8x16xbf16>, vector<8x8x8xf32> -> vector<8x8x8xf32>
    "tpu.trace_stop"() : () -> ()
    %cst_6 = arith.constant dense<0xFF800000> : vector<8x8xf32>
    %21 = vector.multi_reduction <maximumf>, %20, %cst_6 [2] : vector<8x8x8xf32> to vector<8x8xf32>
    %22 = vector.shape_cast %21 : vector<8x8xf32> to vector<8x8x1xf32>
    %23 = vector.broadcast %22 : vector<8x8x1xf32> to vector<8x8x8xf32>
    %24 = arith.subf %20, %23 : vector<8x8x8xf32>
    %25 = math.exp %24 : vector<8x8x8xf32>
    %cst_7 = arith.constant dense<0.000000e+00> : vector<8x8xf32>
    %26 = vector.multi_reduction <add>, %25, %cst_7 [2] : vector<8x8x8xf32> to vector<8x8xf32>
    %27 = vector.shape_cast %26 : vector<8x8xf32> to vector<8x8x1xf32>
    %28 = tpu.reciprocal %27 : vector<8x8x1xf32> -> vector<8x8x1xf32>
    %29 = vector.broadcast %28 : vector<8x8x1xf32> to vector<8x8x8xf32>
    %30 = arith.mulf %25, %29 : vector<8x8x8xf32>
    %31 = arith.truncf %30 : vector<8x8x8xf32> to vector<8x8x8xbf16>
    %32 = arith.truncf %17 : vector<8x8x16xf32> to vector<8x8x16xbf16>
    "tpu.trace_start"() <{level = 10 : i32, message = "bqk,bkd->bqd"}> : () -> ()
    %cst_8 = arith.constant dense<0.000000e+00> : vector<8x8x16xf32>
    %33 = tpu.matmul %31, %32, %cst_8 {dimension_numbers = #tpu.dot_dimension_numbers<[2], [1], [1], [2], [0, 0, 0, 1, 1, 2], [0], [0]>} : vector<8x8x8xbf16>, vector<8x8x16xbf16>, vector<8x8x16xf32> -> vector<8x8x16xf32>
    "tpu.trace_stop"() : () -> ()
    %34 = vector.shape_cast %33 : vector<8x8x16xf32> to vector<2x4x8x16xf32>
    %35 = tpu.transpose %34, [0, 2, 1, 3] : vector<2x4x8x16xf32> -> vector<2x8x4x16xf32>
    %36 = vector.shape_cast %35 : vector<2x8x4x16xf32> to vector<16x64xf32>
    %37 = arith.truncf %36 : vector<16x64xf32> to vector<16x64xbf16>
    %38 = vector.extract_strided_slice %2 {offsets = [0, 0], sizes = [64, 32], strides = [1, 1]} : vector<65x32xf32> to vector<64x32xf32>
    %39 = arith.truncf %38 : vector<64x32xf32> to vector<64x32xbf16>
    %cst_9 = arith.constant dense<0.000000e+00> : vector<16x32xf32>
    %40 = tpu.matmul %37, %39, %cst_9 {dimension_numbers = #tpu.dot_dimension_numbers<[1], [0], [0], [1], [0, 0, 1, 1], [], []>} : vector<16x64xbf16>, vector<64x32xbf16>, vector<16x32xf32> -> vector<16x32xf32>
    %41 = vector.extract_strided_slice %2 {offsets = [64, 0], sizes = [1, 32], strides = [1, 1]} : vector<65x32xf32> to vector<1x32xf32>
    %42 = vector.broadcast %41 : vector<1x32xf32> to vector<16x32xf32>
    %43 = arith.addf %40, %42 : vector<16x32xf32>
    %c0_10 = arith.constant 0 : index
    %c0_11 = arith.constant 0 : index
    %44 = vector.load %arg3[%c0_10, %c0_11] : memref<16x32xf32, #tpu.memory_space<vmem>>, vector<16x32xf32>
    tpu.vector_store %arg3[%c0_10, %c0_11], %43 {strides = array<i32>} : memref<16x32xf32, #tpu.memory_space<vmem>>, vector<16x32xf32>,
    return
  }
}

</mosaic_0001>

<bundles_post_ra>
// kernel: tpu_custom_call.1
= control target key start
LH: loop header
LB: loop body
LE: loop exit
PB: predicated region body
PF: predicated region fallthrough
CT: control target
= control target key end

     0   :  { %v2487_v7 = vmov 0   ;;  %s3019_s0 = inlined_call_operand.vmem [shape: f32[16,32], index: 0, kind: input, shape index: {}]   ;;  %s3020_s1 = inlined_call_operand.vmem [shape: f32[33,192], index: 1, kind: input, shape index: {}]   ;;  %s3021_s2 = inlined_call_operand.vmem [shape: f32[65,32], index: 2, kind: input, shape index: {}]   ;;  %s3022_s3 = inlined_call_operand.hbm [shape: f32[16,32], index: 3, kind: output, shape index: {}]  }
   0x1   :  { %v19_v0 = vld [vmem:[%s3020_s1 + $0x8] sm:$0xff]  ;;  %v21_v1 = vld [vmem:[%s3020_s1 + $0x18] sm:$0xff]  ;;  %v18_v2 = vld [vmem:[%s3020_s1] sm:$0xff]  ;;  %86 = vmatprep.mubr.bf16.mxu0 %v2487_v7 }
   0x2   :  { %v39_v3 = vpack.c.bf16 %v21_v1, %v19_v0  ;;  %v20_v4 = vld [vmem:[%s3020_s1 + $0x10] sm:$0xff]  ;;  %v23_v5 = vld [vmem:[%s3020_s1 + $0x28] sm:$0xff]  ;;  %v25_v6 = vld [vmem:[%s3020_s1 + $0x38] sm:$0xff] }
   0x3   :  { %v38_v8 = vpack.c.bf16 %v20_v4, %v18_v2  ;;  %v41_v9 = vpack.c.bf16 %v25_v6, %v23_v5  ;;  %v22_v10 = vld [vmem:[%s3020_s1 + $0x20] sm:$0xff]  ;;  %v24_v11 = vld [vmem:[%s3020_s1 + $0x30] sm:$0xff] }
   0x4   :  { %54 = vmatprep.subr.bf16.mxu0 %v39_v3 }
   0x5   :  { %8 = vsyncpa [#allocation3], 0  ;;  %55 = vmatpush1.bf16.msra.mxu0 %v38_v8  ;;  %v40_v12 = vpack.c.bf16 %v24_v11, %v22_v10  ;;  %v16_v13 = vld [vmem:[%s3019_s0] sm:$0xff]  ;;  %v17_v14 = vld [vmem:[%s3019_s0 + $0x8] sm:$0xff]  ;;  %vm50_vm0 = vcmask 261120   ;;  %s2488_s0 = smov 32   ;;  %v166_v29 = vlaneseq }
   0x6   :  { %56 = vmatprep.subr.bf16.mxu0 %v41_v9  ;;  %v37_v15 = vpack.c.bf16 %v17_v14, %v16_v13  ;;  %v2211_v16 = vld [vmem:[%s3020_s1 + $0x40] ss:$0 sm:$0xff]  ;;  %v2212_v21 = vld [vmem:[%s3020_s1 + $0x48] ss:$0 sm:$0xff]  ;;  %s2489_s9 = smov 64   ;;  %s2490_s10 = smov 16  }
   0x7   :  { %s2491_s11 = smov 48   ;;  %s2492_s12 = smov 96   ;;  %v2495_v25 = vmov 0.0   ;;  %vm2496_vm1 = vmmov 0   ;;  %v2497_v27 = vmov 1983009808  }
   0x8   :  { %s2493_s1 = smov 112   ;;  %s2494_s13 = smov 80   ;;  %2293 = vmatprep.subr.bf16.mxu1 %v2495_v25  ;;  %2295 = vmatprep.mubr.msk.bf16.mxu1 %vm2496_vm1, %v2495_v25  ;;  %v164_v28 = vunpack.c.l.s4 %v2497_v27  ;;  %v2498_v30 = vmov 1934713408   ;;  %v167_v33 = vshrl.u32 %v166_v29, 7  ;;  %vm993_vm2 = vcmask 130048  }
   0x9   :  { %57 = vmatpush1.bf16.msra.mxu0 %v40_v12  ;;  %v228_v31 = vunpack.c.l.s4 %v2498_v30  ;;  %vm1362_vm3 = vcmask 64512   ;;  %vm1470_vm4 = vcmask 1043456   ;;  %vm2136_vm5 = vcmask 392192   ;;  %s2499_s5 = smov [#allocation2]  }
   0xa   :  { %2299 = vmatprep.subr.bf16.mxu0 %v2495_v25  ;;  %v165_v32 = vunpack.c.0.s8 %v164_v28  ;;  %vm2148_vm6 = vcmask 523264   ;;  %s2200_s6 = sshll.u32 %s2499_s5, 4  ;;  %s2201_s6 = int_to_ptr.vmem [resolvable:$true] %s2200_s6 }
   0xb   :  { %v229_v36 = vunpack.c.0.s8 %v228_v31  ;;  %s2463_s7 = scalar_lea.vmem %s2201_s6, 256  ;;  %p2468_p1 = scmp.lt.s32.totalorder %s2201_s6, %s2201_s6 }
   0xc   :  { %2213 = vmatmul.mubr.msk.bf16.vlgmr.msra.gmra.mrb[0].mxu0 %vm50_vm0, %v37_v15  ;;  %v2601_v37 = vsub.s32 %v165_v32, %v167_v33  ;;  %p2464_p0 = scmp.ne.s32.totalorder %s2201_s6, %s2463_s7  ;;  %p2469_p2 = scmp.lt.s32.totalorder %s2463_s7, %s2463_s7 }
   0xd   :  { %2301 = vmatprep.mubr.msk.bf16.mxu0 %vm2496_vm1, %v2495_v25  ;;  %v2603_v44 = vsub.s32 %v229_v36, %v167_v33 }
   0xe   :  { %p2470_p3 = por %p2469_p2, %p2468_p1 }
  0x10   :  { %p2471_p4 = pnand %p2470_p3, %p2464_p0 }
  0xdf   :  { %v88_v17 = vpop.f32.mrb[0].mxu0 }
  0xe0   :  { %v2556_v18 = vadd.f32 %v2211_v16, %v88_v17  ;;  %v90_v19 = vpop.f32.mrb[1].mxu0 }
  0xe1   :  { %v92_v20 = vpop.f32.mrb[2].mxu0  ;;  %v2597_v26 = vadd.f32 %v2212_v21, %v90_v19 }
  0xe2   :  { %v94_v22 = vpop.f32.mrb[3].mxu0  ;;  %129 = vrot.lane.b32.xlu1 %v2556_v18, %s2488_s0  ;;  %117 = vrot.lane.b32.xlu0 %v2556_v18, %s2489_s9  ;;  %v2574_v24 = vadd.f32 %v2211_v16, %v92_v20 }
  0xe3   :  { %v2564_v23 = vadd.f32 %v2212_v21, %v94_v22 }
  0xe6   :  { %135 = vrot.lane.b32.xlu1 %v2556_v18, %s2490_s10  ;;  %123 = vrot.lane.b32.xlu0 %v2556_v18, %s2491_s11 }
  0xea   :  { %105 = vrot.lane.b32.xlu1 %v2556_v18, %s2492_s12  ;;  %99 = vrot.lane.b32.xlu0 %v2556_v18, %s2493_s1 }
  0xee   :  { %119 = vrot.lane.b32.xlu1 %v2574_v24, %s2489_s9  ;;  %111 = vrot.lane.b32.xlu0 %v2556_v18, %s2494_s13 }
  0xf2   :  { %131 = vrot.lane.b32.xlu1 %v2574_v24, %s2488_s0  ;;  %125 = vrot.lane.b32.xlu0 %v2574_v24, %s2491_s11 }
  0xf6   :  { %101 = vrot.lane.b32.xlu1 %v2574_v24, %s2493_s1  ;;  %137 = vrot.lane.b32.xlu0 %v2574_v24, %s2490_s10 }
  0xfa   :  { %113 = vrot.lane.b32.xlu1 %v2574_v24, %s2494_s13  ;;  %107 = vrot.lane.b32.xlu0 %v2574_v24, %s2492_s12 }
  0xfe   :  { %143 = vrot.lane.b32.xlu1 %v2597_v26, %s2493_s1 }
 0x154   :  { %v130_v34 = vpop.permute.xlu1 %129  ;;  %v118_v35 = vpop.permute.xlu0 %117 }
 0x155   :  { %v193_v38 = vcombine.low %v118_v35, %v130_v34  ;;  %v194_v39 = vcombine.high %v118_v35, %v130_v34 }
 0x157   :  { %v201_v45 = vrot.slane %v193_v38, %v2601_v37  ;;  %v208_v46 = vrot.slane %v194_v39, %v2601_v37 }
 0x158   :  { %v136_v40 = vpop.permute.xlu1 %135  ;;  %v124_v41 = vpop.permute.xlu0 %123 }
 0x159   :  { %v209_v42 = vcombine.low %v124_v41, %v136_v40  ;;  %v210_v43 = vcombine.high %v124_v41, %v136_v40 }
 0x15b   :  { %v217_v47 = vrot.slane %v209_v42, %v2601_v37  ;;  %v224_v48 = vrot.slane %v210_v43, %v2601_v37 }
 0x15c   :  { %v106_v49 = vpop.permute.xlu1 %105  ;;  %v100_v50 = vpop.permute.xlu0 %99 }
 0x15d   :  { %v257_v51 = vcombine.low %v201_v45, %v217_v47  ;;  %v258_v52 = vcombine.high %v201_v45, %v217_v47  ;;  %v273_v53 = vcombine.low %v208_v46, %v224_v48  ;;  %v274_v54 = vcombine.high %v208_v46, %v224_v48 }
 0x15e   :  { %v161_v59 = vcombine.low %v2556_v18, %v106_v49  ;;  %v162_v60 = vcombine.high %v2556_v18, %v106_v49 }
 0x15f   :  { %v265_v55 = vrot.slane %v257_v51, %v2603_v44  ;;  %v272_v56 = vrot.slane %v258_v52, %v2603_v44  ;;  %v281_v57 = vrot.slane %v273_v53, %v2603_v44  ;;  %v288_v58 = vrot.slane %v274_v54, %v2603_v44 }
 0x160   :  { %v120_v61 = vpop.permute.xlu1 %119  ;;  %v112_v62 = vpop.permute.xlu0 %111  ;;  %v169_v9 = vrot.slane %v161_v59, %v2601_v37  ;;  %v176_v10 = vrot.slane %v162_v60, %v2601_v37 }
 0x161   :  { %v2215_v63 = vcombine.low %v265_v55, %v272_v56  ;;  %v2217_v0 = vcombine.high %v265_v55, %v272_v56  ;;  %v2219_v1 = vcombine.low %v281_v57, %v288_v58  ;;  %v2221_v2 = vcombine.high %v281_v57, %v288_v58 }
 0x162   :  { %v177_v3 = vcombine.low %v100_v50, %v112_v62  ;;  %v178_v4 = vcombine.high %v100_v50, %v112_v62 }
 0x163   :  { %v2616_v5 = vrot.slane %v2215_v63, %v2601_v37  ;;  %v2619_v6 = vrot.slane %v2217_v0, %v2601_v37  ;;  %v2622_v7 = vrot.slane %v2219_v1, %v2601_v37  ;;  %v2625_v8 = vrot.slane %v2221_v2, %v2601_v37 }
 0x164   :  { %v185_v11 = vrot.slane %v177_v3, %v2601_v37  ;;  %v192_v12 = vrot.slane %v178_v4, %v2601_v37  ;;  %v132_v13 = vpop.permute.xlu1 %131  ;;  %v126_v14 = vpop.permute.xlu0 %125 }
 0x165   :  { %v649_v15 = vcombine.low %v2616_v5, %v2619_v6  ;;  %v681_v16 = vcombine.low %v2622_v7, %v2625_v8  ;;  %v397_v21 = vcombine.low %v120_v61, %v132_v13  ;;  %v398_v22 = vcombine.high %v120_v61, %v132_v13 }
 0x166   :  { %v225_v17 = vcombine.low %v169_v9, %v185_v11  ;;  %v226_v18 = vcombine.high %v169_v9, %v185_v11  ;;  %v241_v19 = vcombine.low %v176_v10, %v192_v12  ;;  %v242_v20 = vcombine.high %v176_v10, %v192_v12 }
 0x167   :  { %v657_v27 = vrot.slane %v649_v15, %v2603_v44  ;;  %v689_v28 = vrot.slane %v681_v16, %v2603_v44  ;;  %v405_v45 = vrot.slane %v397_v21, %v2601_v37  ;;  %v412_v46 = vrot.slane %v398_v22, %v2601_v37 }
 0x168   :  { %v233_v29 = vrot.slane %v225_v17, %v2603_v44  ;;  %v240_v30 = vrot.slane %v226_v18, %v2603_v44  ;;  %v249_v31 = vrot.slane %v241_v19, %v2603_v44  ;;  %v256_v32 = vrot.slane %v242_v20, %v2603_v44  ;;  %v102_v33 = vpop.permute.xlu1 %101  ;;  %v138_v34 = vpop.permute.xlu0 %137 }
 0x169   :  { %v413_v35 = vcombine.low %v126_v14, %v138_v34  ;;  %v414_v36 = vcombine.high %v126_v14, %v138_v34  ;;  %v701_v38 = vcombine.low %v657_v27, %v689_v28  ;;  %v702_v39 = vcombine.high %v657_v27, %v689_v28 }
 0x16a   :  { %v2214_v40 = vcombine.low %v233_v29, %v240_v30  ;;  %v2216_v41 = vcombine.high %v233_v29, %v240_v30  ;;  %v2218_v42 = vcombine.low %v249_v31, %v256_v32  ;;  %v2220_v43 = vcombine.high %v249_v31, %v256_v32 }
 0x16b   :  { %v421_v47 = vrot.slane %v413_v35, %v2601_v37  ;;  %v428_v48 = vrot.slane %v414_v36, %v2601_v37  ;;  %v985_v61 = vpack.c.bf16 %v701_v38, %v701_v38  ;;  %v986_v62 = vpack.c.bf16 %v702_v39, %v702_v39 }
 0x16c   :  { %v2646_v49 = vrot.slane %v2214_v40, %v2601_v37  ;;  %v2649_v50 = vrot.slane %v2216_v41, %v2601_v37  ;;  %v2652_v51 = vrot.slane %v2218_v42, %v2601_v37  ;;  %v2655_v52 = vrot.slane %v2220_v43, %v2601_v37  ;;  %v114_v53 = vpop.permute.xlu1 %113  ;;  %v108_v58 = vpop.permute.xlu0 %107 }
 0x16d   :  { %v461_v54 = vcombine.low %v405_v45, %v421_v47  ;;  %v462_v55 = vcombine.high %v405_v45, %v421_v47  ;;  %v477_v56 = vcombine.low %v412_v46, %v428_v48  ;;  %v478_v57 = vcombine.high %v412_v46, %v428_v48 }
 0x16e   :  { %v381_v59 = vcombine.low %v102_v33, %v114_v53  ;;  %v382_v60 = vcombine.high %v102_v33, %v114_v53  ;;  %v365_v9 = vcombine.low %v2574_v24, %v108_v58  ;;  %v366_v10 = vcombine.high %v2574_v24, %v108_v58 }
 0x16f   :  { %v469_v63 = vrot.slane %v461_v54, %v2603_v44  ;;  %v476_v0 = vrot.slane %v462_v55, %v2603_v44  ;;  %v485_v1 = vrot.slane %v477_v56, %v2603_v44  ;;  %v492_v2 = vrot.slane %v478_v57, %v2603_v44 }
 0x170   :  { %v389_v3 = vrot.slane %v381_v59, %v2601_v37  ;;  %v396_v4 = vrot.slane %v382_v60, %v2601_v37  ;;  %v634_v11 = vcombine.high %v2646_v49, %v2649_v50  ;;  %v666_v12 = vcombine.high %v2652_v51, %v2655_v52 }
 0x171   :  { %v2225_v13 = vcombine.low %v469_v63, %v476_v0  ;;  %v373_v14 = vrot.slane %v365_v9, %v2601_v37  ;;  %v380_v15 = vrot.slane %v366_v10, %v2601_v37  ;;  %v998_v16 = vsel %vm993_vm2, %v985_v61, 0 }
 0x172   :  { %v1044_v17 = vsel %vm993_vm2, %v986_v62, 0  ;;  %v2227_v19 = vcombine.high %v469_v63, %v476_v0  ;;  %v2229_v24 = vcombine.low %v485_v1, %v492_v2  ;;  %v2231_v20 = vcombine.high %v485_v1, %v492_v2  ;;  %2294 = vmatpush3.bf16.xpose.msra.mxu1 %v998_v16 }
 0x173   :  { %v2674_v18 = vrot.slane %v2225_v13, %v2601_v37  ;;  %v429_v21 = vcombine.low %v373_v14, %v389_v3  ;;  %v430_v22 = vcombine.high %v373_v14, %v389_v3  ;;  %v445_v27 = vcombine.low %v380_v15, %v396_v4  ;;  %2300 = vmatpush3.bf16.xpose.msra.mxu0 %v1044_v17 }
 0x174   :  { %v446_v28 = vcombine.high %v380_v15, %v396_v4  ;;  %v633_v29 = vcombine.low %v2646_v49, %v2649_v50  ;;  %v665_v30 = vcombine.low %v2652_v51, %v2655_v52  ;;  %2305 = vmatprep.subr.bf16.mxu1 %v2495_v25  ;;  %2311 = vmatprep.subr.bf16.mxu0 %v2495_v25 }
 0x175   :  { %v650_v31 = vcombine.high %v2616_v5, %v2619_v6  ;;  %v437_v32 = vrot.slane %v429_v21, %v2603_v44  ;;  %v444_v33 = vrot.slane %v430_v22, %v2603_v44  ;;  %v453_v34 = vrot.slane %v445_v27, %v2603_v44 }
 0x176   :  { %v460_v35 = vrot.slane %v446_v28, %v2603_v44  ;;  %v641_v36 = vrot.slane %v633_v29, %v2603_v44  ;;  %v673_v38 = vrot.slane %v665_v30, %v2603_v44  ;;  %v682_v40 = vcombine.high %v2622_v7, %v2625_v8 }
 0x177   :  { %v664_v39 = vrot.slane %v650_v31, %v2603_v44  ;;  %v2224_v41 = vcombine.low %v437_v32, %v444_v33  ;;  %v2226_v42 = vcombine.high %v437_v32, %v444_v33  ;;  %v804_v43 = vrot.slane %v2227_v19, %v2601_v37 }
 0x178   :  { %v2228_v5 = vcombine.low %v453_v34, %v460_v35  ;;  %v2230_v6 = vcombine.high %v453_v34, %v460_v35  ;;  %v697_v45 = vcombine.low %v641_v36, %v673_v38  ;;  %v698_v46 = vcombine.high %v641_v36, %v673_v38 }
 0x179   :  { %v696_v47 = vrot.slane %v682_v40, %v2603_v44  ;;  %v820_v48 = vrot.slane %v2229_v24, %v2601_v37  ;;  %v836_v49 = vrot.slane %v2231_v20, %v2601_v37  ;;  %v2698_v50 = vrot.slane %v2224_v41, %v2601_v37 }
 0x17a   :  { %v797_v51 = vrot.slane %v2226_v42, %v2601_v37  ;;  %v977_v7 = vpack.c.bf16 %v697_v45, %v697_v45  ;;  %v978_v8 = vpack.c.bf16 %v698_v46, %v698_v46  ;;  %v813_v54 = vrot.slane %v2228_v5, %v2601_v37 }
 0x17b   :  { %v703_v52 = vcombine.low %v664_v39, %v696_v47  ;;  %v704_v53 = vcombine.high %v664_v39, %v696_v47  ;;  %v829_v55 = vrot.slane %v2230_v6, %v2601_v37  ;;  %v648_v56 = vrot.slane %v634_v11, %v2603_v44 }
 0x17c   :  { %2296 = vmatmul.mubr.msk.bf16.vlgmr.msra.gmra.mrb[0].mxu1 %vm993_vm2, %v977_v7  ;;  %2302 = vmatmul.mubr.msk.bf16.vlgmr.msra.gmra.mrb[4].mxu0 %vm993_vm2, %v978_v8  ;;  %v680_v59 = vrot.slane %v666_v12, %v2603_v44  ;;  %v853_v60 = vcombine.low %v2674_v18, %v804_v43  ;;  %v885_v61 = vcombine.low %v820_v48, %v836_v49 }
 0x17d   :  { %v987_v57 = vpack.c.bf16 %v703_v52, %v703_v52  ;;  %v988_v58 = vpack.c.bf16 %v704_v53, %v704_v53  ;;  %2307 = vmatprep.mubr.msk.bf16.mxu1 %vm2496_vm1, %v2495_v25  ;;  %2313 = vmatprep.mubr.msk.bf16.mxu0 %vm2496_vm1, %v2495_v25  ;;  %v837_v62 = vcombine.low %v2698_v50, %v797_v51 }
 0x17e   :  { %v869_v1 = vcombine.low %v813_v54, %v829_v55  ;;  %v861_v2 = vrot.slane %v853_v60, %v2603_v44  ;;  %v893_v3 = vrot.slane %v885_v61, %v2603_v44  ;;  %v699_v4 = vcombine.low %v648_v56, %v680_v59 }
 0x17f   :  { %v1090_v63 = vsel %vm993_vm2, %v987_v57, 0  ;;  %v1136_v0 = vsel %vm993_vm2, %v988_v58, 0  ;;  %v700_v9 = vcombine.high %v648_v56, %v680_v59  ;;  %v854_v10 = vcombine.high %v2674_v18, %v804_v43 }
 0x180   :  { %2306 = vmatpush3.bf16.xpose.msra.mxu1 %v1090_v63  ;;  %2312 = vmatpush3.bf16.xpose.msra.mxu0 %v1136_v0  ;;  %v905_v11 = vcombine.low %v861_v2, %v893_v3  ;;  %v906_v12 = vcombine.high %v861_v2, %v893_v3  ;;  %v886_v14 = vcombine.high %v820_v48, %v836_v49 }
 0x181   :  { %2317 = vmatprep.subr.bf16.mxu1 %v2495_v25  ;;  %2323 = vmatprep.subr.bf16.mxu0 %v2495_v25  ;;  %v868_v13 = vrot.slane %v854_v10, %v2603_v44  ;;  %v845_v17 = vrot.slane %v837_v62, %v2603_v44  ;;  %v979_v19 = vpack.c.bf16 %v699_v4, %v699_v4 }
 0x182   :  { %v989_v15 = vpack.c.bf16 %v905_v11, %v905_v11  ;;  %v990_v16 = vpack.c.bf16 %v906_v12, %v906_v12  ;;  %v980_v24 = vpack.c.bf16 %v700_v9, %v700_v9  ;;  %v877_v20 = vrot.slane %v869_v1, %v2603_v44 }
 0x183   :  { %v900_v21 = vrot.slane %v886_v14, %v2603_v44  ;;  %v838_v29 = vcombine.high %v2698_v50, %v797_v51  ;;  %v870_v30 = vcombine.high %v813_v54, %v829_v55 }
 0x184   :  { %v1182_v22 = vsel %vm993_vm2, %v989_v15, 0  ;;  %v1228_v27 = vsel %vm993_vm2, %v990_v16, 0  ;;  %v901_v31 = vcombine.low %v845_v17, %v877_v20  ;;  %v902_v32 = vcombine.high %v845_v17, %v877_v20 }
 0x185   :  { %v907_v18 = vcombine.low %v868_v13, %v900_v21  ;;  %v908_v28 = vcombine.high %v868_v13, %v900_v21  ;;  %v852_v38 = vrot.slane %v838_v29, %v2603_v44  ;;  %v884_v39 = vrot.slane %v870_v30, %v2603_v44 }
 0x186   :  { %v981_v35 = vpack.c.bf16 %v901_v31, %v901_v31  ;;  %v982_v36 = vpack.c.bf16 %v902_v32, %v902_v32 }
 0x187   :  { %2308 = vmatmul.mubr.msk.bf16.vlgmr.msra.gmra.mrb[4].mxu1 %vm993_vm2, %v979_v19  ;;  %2314 = vmatmul.mubr.msk.bf16.vlgmr.msra.gmra.mrb[8].mxu0 %vm993_vm2, %v980_v24  ;;  %v991_v33 = vpack.c.bf16 %v907_v18, %v907_v18  ;;  %v992_v34 = vpack.c.bf16 %v908_v28, %v908_v28  ;;  %v903_v42 = vcombine.low %v852_v38, %v884_v39 }
 0x188   :  { %2318 = vmatpush3.bf16.xpose.msra.mxu1 %v1182_v22  ;;  %2324 = vmatpush3.bf16.xpose.msra.mxu0 %v1228_v27  ;;  %v904_v5 = vcombine.high %v852_v38, %v884_v39  ;;  %v144_v27 = vpop.permute.xlu1 %143 }
 0x189   :  { %2319 = vmatprep.mubr.msk.bf16.mxu1 %vm2496_vm1, %v2495_v25  ;;  %2325 = vmatprep.mubr.msk.bf16.mxu0 %vm2496_vm1, %v2495_v25  ;;  %v1274_v40 = vsel %vm993_vm2, %v991_v33, 0  ;;  %v1320_v41 = vsel %vm993_vm2, %v992_v34, 0  ;;  %v983_v6 = vpack.c.bf16 %v903_v42, %v903_v42 }
 0x18a   :  { %2329 = vmatprep.subr.bf16.mxu1 %v2495_v25  ;;  %2335 = vmatprep.subr.bf16.mxu0 %v2495_v25  ;;  %v984_v43 = vpack.c.bf16 %v904_v5, %v904_v5 }
 0x18f   :  { %2320 = vmatmul.mubr.msk.bf16.vlgmr.msra.gmra.mrb[8].mxu1 %vm993_vm2, %v981_v35  ;;  %2326 = vmatmul.mubr.msk.bf16.vlgmr.msra.gmra.mrb[12].mxu0 %vm993_vm2, %v982_v36 }
 0x190   :  { %2330 = vmatpush3.bf16.xpose.msra.mxu1 %v1274_v40  ;;  %2336 = vmatpush3.bf16.xpose.msra.mxu0 %v1320_v41 }
 0x191   :  { %2331 = vmatprep.mubr.msk.bf16.mxu1 %vm2496_vm1, %v2495_v25  ;;  %2337 = vmatprep.mubr.msk.bf16.mxu0 %vm2496_vm1, %v2495_v25 }
 0x192   :  { %2341 = vmatprep.subr.bf16.mxu1 %v2495_v25  ;;  %2347 = vmatprep.subr.bf16.mxu0 %v2495_v25 }
 0x197   :  { %2332 = vmatmul.mubr.msk.bf16.vlgmr.msra.gmra.mrb[12].mxu1 %vm993_vm2, %v983_v6  ;;  %2338 = vmatmul.mubr.msk.bf16.vlgmr.msra.gmra.mrb[16].mxu0 %vm993_vm2, %v984_v43 }
 0x198   :  { %2343 = vmatprep.mubr.msk.bf16.mxu1 %vm2496_vm1, %v2495_v25  ;;  %2349 = vmatprep.mubr.msk.bf16.mxu0 %vm2496_vm1, %v2495_v25 }
 0x24f   :  { %v1034_v45 = vpop.f32.mrb[0].mxu1  ;;  %v1080_v46 = vpop.f32.mrb[4].mxu0 }
 0x250   :  { %v2297_v47 = vpop.f32.mrb[1].mxu1  ;;  %v2303_v48 = vpop.f32.mrb[5].mxu0  ;;  %v1366_v49 = vsel %vm1362_vm3, %v1080_v46, -inf  ;;  %v1363_v50 = vsel %vm1362_vm3, %v1034_v45, -inf }
 0x251   :  { %1367 = vmax.xlane.f32.xlu1 %v1366_v49  ;;  %v1083_v51 = vpop.f32.mrb[6].mxu0  ;;  %1364 = vmax.xlane.f32.xlu0 %v1363_v50  ;;  %v1037_v7 = vpop.f32.mrb[2].mxu1 }
 0x252   :  { %v2298_v8 = vpop.f32.mrb[3].mxu1  ;;  %v2304_v52 = vpop.f32.mrb[7].mxu0 }
 0x25a   :  { %v1126_v53 = vpop.f32.mrb[4].mxu1  ;;  %v1172_v54 = vpop.f32.mrb[8].mxu0 }
 0x25b   :  { %v2309_v55 = vpop.f32.mrb[5].mxu1  ;;  %v2315_v56 = vpop.f32.mrb[9].mxu0  ;;  %v1369_v57 = vsel %vm1362_vm3, %v1126_v53, -inf  ;;  %v1372_v62 = vsel %vm1362_vm3, %v1172_v54, -inf }
 0x25c   :  { %v1175_v58 = vpop.f32.mrb[10].mxu0  ;;  %1370 = vmax.xlane.f32.xlu0 %v1369_v57  ;;  %v1129_v59 = vpop.f32.mrb[6].mxu1 }
 0x25d   :  { %v2310_v60 = vpop.f32.mrb[7].mxu1  ;;  %v2316_v61 = vpop.f32.mrb[11].mxu0 }
 0x260   :  { %1373 = vmax.xlane.f32.xlu0 %v1372_v62 }
 0x262   :  { %v1218_v63 = vpop.f32.mrb[8].mxu1  ;;  %v2757_v0 = vpop.f32.mrb[12].mxu0 }
 0x263   :  { %v2321_v1 = vpop.f32.mrb[9].mxu1  ;;  %v2327_v2 = vpop.f32.mrb[13].mxu0  ;;  %v1378_v3 = vsel %vm1362_vm3, %v2757_v0, -inf  ;;  %v1375_v4 = vsel %vm1362_vm3, %v1218_v63, -inf }
 0x264   :  { %1379 = vmax.xlane.f32.xlu0 %v1378_v3  ;;  %v1267_v9 = vpop.f32.mrb[14].mxu0  ;;  %1376 = vmax.xlane.f32.xlu1 %v1375_v4  ;;  %v1221_v10 = vpop.f32.mrb[10].mxu1 }
 0x265   :  { %v2322_v11 = vpop.f32.mrb[11].mxu1  ;;  %v2328_v12 = vpop.f32.mrb[15].mxu0 }
 0x26a   :  { %v2762_v13 = vpop.f32.mrb[12].mxu1  ;;  %v2764_v14 = vpop.f32.mrb[16].mxu0 }
 0x26b   :  { %v2333_v15 = vpop.f32.mrb[13].mxu1  ;;  %v2339_v16 = vpop.f32.mrb[17].mxu0  ;;  %v1384_v17 = vsel %vm1362_vm3, %v2764_v14, -inf  ;;  %v1381_v19 = vsel %vm1362_vm3, %v2762_v13, -inf }
 0x26c   :  { %1385 = vmax.xlane.f32.xlu0 %v1384_v17  ;;  %v1359_v24 = vpop.f32.mrb[18].mxu0  ;;  %1382 = vmax.xlane.f32.xlu1 %v1381_v19  ;;  %v1313_v20 = vpop.f32.mrb[14].mxu1 }
 0x26d   :  { %v2334_v21 = vpop.f32.mrb[15].mxu1  ;;  %v2340_v22 = vpop.f32.mrb[19].mxu0 }
 0x27d   :  { %155 = vrot.lane.b32.xlu1 %v2597_v26, %s2494_s13 }
 0x282   :  { %149 = vrot.lane.b32.xlu0 %v2597_v26, %s2492_s12 }
 0x2de   :  { %v1368_v18 = vpop.xlane.xlu1 %1367  ;;  %v1365_v28 = vpop.xlane.xlu0 %1364 }
 0x2df   :  { %v1388_v29 = vsub.f32 %v1080_v46, %v1368_v18  ;;  %v1387_v30 = vsub.f32 %v1034_v45, %v1365_v28 }
 0x2e1   :  { %v1397_v31 = vmul.f32 1.442695, %v1388_v29  ;;  %v1395_v32 = vmul.f32 1.442695, %v1387_v30 }
 0x2e3   :  { %2431 = vpow2.f32 %v1397_v31 }
 0x2e4   :  { %2433 = vpow2.f32 %v1395_v32 }
 0x2e9   :  { %v1371_v33 = vpop.xlane.xlu0 %1370 }
 0x2ea   :  { %v1389_v34 = vsub.f32 %v1126_v53, %v1371_v33 }
 0x2ec   :  { %v1399_v35 = vmul.f32 1.442695, %v1389_v34 }
 0x2ed   :  { %v1374_v36 = vpop.xlane.xlu0 %1373  ;;  %v2774_v38 = vpop.eup %2431 }
 0x2ee   :  { %2435 = vpow2.f32 %v1399_v35  ;;  %v1390_v39 = vsub.f32 %v1172_v54, %v1374_v36  ;;  %v2776_v40 = vpop.eup %2433  ;;  %v1414_v41 = vsel %vm1362_vm3, %v2774_v38, 0.0 }
 0x2ef   :  { %1415 = vadd.xlane.f32.xlu0 %v1414_v41  ;;  %v1411_v5 = vsel %vm1362_vm3, %v2776_v40, 0.0 }
 0x2f0   :  { %v1401_v42 = vmul.f32 1.442695, %v1390_v39  ;;  %1412 = vadd.xlane.f32.xlu1 %v1411_v5 }
 0x2f1   :  { %v1377_v6 = vpop.xlane.xlu1 %1376  ;;  %v2782_v46 = vpop.xlane.xlu0 %1379 }
 0x2f2   :  { %2437 = vpow2.f32 %v1401_v42  ;;  %v1391_v43 = vsub.f32 %v1218_v63, %v1377_v6  ;;  %v1392_v6 = vsub.f32 %v2757_v0, %v2782_v46 }
 0x2f4   :  { %v1403_v45 = vmul.f32 1.442695, %v1391_v43  ;;  %v1405_v43 = vmul.f32 1.442695, %v1392_v6 }
 0x2f6   :  { %2439 = vpow2.f32 %v1403_v45 }
 0x2f7   :  { %2441 = vpow2.f32 %v1405_v43 }
 0x2f8   :  { %v2784_v47 = vpop.eup %2435 }
 0x2f9   :  { %v2786_v48 = vpop.xlane.xlu1 %1382  ;;  %v2788_v49 = vpop.xlane.xlu0 %1385  ;;  %v1417_v50 = vsel %vm1362_vm3, %v2784_v47, 0.0 }
 0x2fa   :  { %v1394_v51 = vsub.f32 %v2764_v14, %v2788_v49  ;;  %1418 = vadd.xlane.f32.xlu1 %v1417_v50  ;;  %v1393_v45 = vsub.f32 %v2762_v13, %v2786_v48 }
 0x2fc   :  { %v2794_v7 = vpop.eup %2437  ;;  %v1407_v50 = vmul.f32 1.442695, %v1393_v45  ;;  %v1409_v0 = vmul.f32 1.442695, %v1394_v51 }
 0x2fd   :  { %v156_v8 = vpop.permute.xlu1 %155  ;;  %v150_v52 = vpop.permute.xlu0 %149  ;;  %v1420_v53 = vsel %vm1362_vm3, %v2794_v7, 0.0 }
 0x2fe   :  { %v313_v54 = vcombine.low %v144_v27, %v156_v8  ;;  %v314_v55 = vcombine.high %v144_v27, %v156_v8  ;;  %v297_v56 = vcombine.low %v2597_v26, %v150_v52  ;;  %1421 = vadd.xlane.f32.xlu0 %v1420_v53  ;;  %v298_v57 = vcombine.high %v2597_v26, %v150_v52 }
 0x2ff   :  { %2443 = vpow2.f32 %v1407_v50 }
 0x300   :  { %v2800_v58 = vpop.eup %2439  ;;  %v321_v59 = vrot.slane %v313_v54, %v2601_v37  ;;  %v328_v60 = vrot.slane %v314_v55, %v2601_v37  ;;  %v305_v61 = vrot.slane %v297_v56, %v2601_v37  ;;  %v312_v62 = vrot.slane %v298_v57, %v2601_v37 }
 0x301   :  { %v1423_v63 = vsel %vm1362_vm3, %v2800_v58, 0.0  ;;  %v2832_v8 = vpop.eup %2441  ;;  %2445 = vpow2.f32 %v1409_v0 }
 0x302   :  { %v329_v1 = vcombine.low %v305_v61, %v321_v59  ;;  %v330_v2 = vcombine.high %v305_v61, %v321_v59  ;;  %1424 = vadd.xlane.f32.xlu0 %v1423_v63  ;;  %v345_v3 = vcombine.low %v312_v62, %v328_v60  ;;  %v346_v4 = vcombine.high %v312_v62, %v328_v60 }
 0x303   :  { %v1426_v52 = vsel %vm1362_vm3, %v2832_v8, 0.0 }
 0x304   :  { %v337_v26 = vrot.slane %v329_v1, %v2603_v44  ;;  %v344_v9 = vrot.slane %v330_v2, %v2603_v44  ;;  %v353_v10 = vrot.slane %v345_v3, %v2603_v44  ;;  %v360_v11 = vrot.slane %v346_v4, %v2603_v44 }
 0x306   :  { %v705_v12 = vcombine.low %v337_v26, %v344_v9  ;;  %v2222_v15 = vcombine.high %v337_v26, %v344_v9  ;;  %v721_v16 = vcombine.low %v353_v10, %v360_v11  ;;  %v2223_v17 = vcombine.high %v353_v10, %v360_v11 }
 0x308   :  { %v712_v19 = vrot.slane %v705_v12, %v2601_v37  ;;  %v720_v24 = vrot.slane %v2222_v15, %v2601_v37  ;;  %v728_v20 = vrot.slane %v721_v16, %v2601_v37  ;;  %v736_v21 = vrot.slane %v2223_v17, %v2601_v37 }
 0x309   :  { %v2836_v53 = vpop.eup %2443 }
 0x30a   :  { %v737_v22 = vcombine.low %v712_v19, %v720_v24  ;;  %v738_v27 = vcombine.high %v712_v19, %v720_v24  ;;  %v753_v18 = vcombine.low %v728_v20, %v736_v21  ;;  %v754_v28 = vcombine.high %v728_v20, %v736_v21 }
 0x30b   :  { %151 = vrot.lane.b32.xlu1 %v2564_v23, %s2492_s12  ;;  %v1429_v54 = vsel %vm1362_vm3, %v2836_v53, 0.0  ;;  %v2845_v13 = vpop.eup %2445 }
 0x30c   :  { %v745_v29 = vrot.slane %v737_v22, %v2603_v44  ;;  %v752_v30 = vrot.slane %v738_v27, %v2603_v44  ;;  %v761_v31 = vrot.slane %v753_v18, %v2603_v44  ;;  %v768_v32 = vrot.slane %v754_v28, %v2603_v44 }
 0x30d   :  { %v1432_v46 = vsel %vm1362_vm3, %v2845_v13, 0.0 }
 0x30e   :  { %v769_v33 = vcombine.low %v745_v29, %v761_v31  ;;  %v770_v34 = vcombine.high %v745_v29, %v761_v31  ;;  %v771_v35 = vcombine.low %v752_v30, %v768_v32  ;;  %v772_v36 = vcombine.high %v752_v30, %v768_v32 }
 0x310   :  { %v1459_v39 = vpack.c.bf16 %v769_v33, %v769_v33  ;;  %v1460_v41 = vpack.c.bf16 %v770_v34, %v770_v34  ;;  %v1462_v61 = vpack.c.bf16 %v772_v36, %v772_v36  ;;  %v1461_v49 = vpack.c.bf16 %v771_v35, %v771_v35 }
 0x312   :  { %v1472_v42 = vsel %vm1470_vm4, %v1459_v39, 0  ;;  %v1518_v5 = vsel %vm1470_vm4, %v1460_v41, 0  ;;  %v1610_v1 = vsel %vm1470_vm4, %v1462_v61, 0  ;;  %v1564_v2 = vsel %vm1470_vm4, %v1461_v49, 0 }
 0x313   :  { %2342 = vmatpush3.bf16.msra.mxu1 %v1472_v42  ;;  %2348 = vmatpush3.bf16.msra.mxu0 %v1518_v5 }
 0x314   :  { %2353 = vmatprep.subr.bf16.mxu1 %v2495_v25  ;;  %2359 = vmatprep.subr.bf16.mxu0 %v2495_v25 }
 0x318   :  { %145 = vrot.lane.b32.xlu0 %v2564_v23, %s2493_s1 }
 0x32f   :  { %1427 = vadd.xlane.f32.xlu1 %v1426_v52 }
 0x337   :  { %1430 = vadd.xlane.f32.xlu0 %v1429_v54 }
 0x340   :  { %157 = vrot.lane.b32.xlu1 %v2564_v23, %s2494_s13 }
 0x364   :  { %1433 = vadd.xlane.f32.xlu1 %v1432_v46 }
 0x37c   :  { %v1416_v48 = vpop.xlane.xlu0 %1415 }
 0x37d   :  { %v1413_v55 = vpop.xlane.xlu1 %1412  ;;  %2447 = vrcp.f32 %v1416_v48 }
 0x37e   :  { %2449 = vrcp.f32 %v1413_v55 }
 0x387   :  { %v1419_v56 = vpop.xlane.xlu1 %1418  ;;  %v2448_v57 = vpop.eup %2447 }
 0x388   :  { %2451 = vrcp.f32 %v1419_v56  ;;  %v2450_v59 = vpop.eup %2449  ;;  %v1444_v60 = vmul.f32 %v2448_v57, %v2774_v38 }
 0x389   :  { %v1443_v14 = vmul.f32 %v2450_v59, %v2776_v40 }
 0x38a   :  { %v1452_v62 = vpack.c.bf16 %v1444_v60, %v1444_v60 }
 0x38b   :  { %v1422_v51 = vpop.xlane.xlu0 %1421  ;;  %v1451_v63 = vpack.c.bf16 %v1443_v14, %v1443_v14  ;;  %v152_v10 = vpop.permute.xlu1 %151 }
 0x38c   :  { %2453 = vrcp.f32 %v1422_v51  ;;  %2350 = vmatmul.mubr.msk.bf16.vlgmr.msra.gmra.mrb[20].mxu0 %vm1362_vm3, %v1452_v62  ;;  %v502_v15 = vcombine.high %v2564_v23, %v152_v10 }
 0x38d   :  { %2344 = vmatmul.mubr.msk.bf16.vlgmr.msra.gmra.mrb[16].mxu1 %vm1362_vm3, %v1451_v63  ;;  %2360 = vmatpush3.bf16.msra.mxu0 %v1610_v1 }
 0x38e   :  { %2354 = vmatpush3.bf16.msra.mxu1 %v1564_v2  ;;  %2355 = vmatprep.mubr.msk.bf16.mxu1 %vm2496_vm1, %v2495_v25  ;;  %v516_v20 = vrot.slane %v502_v15, %v2601_v37 }
 0x38f   :  { %2361 = vmatprep.mubr.msk.bf16.mxu0 %vm2496_vm1, %v2495_v25  ;;  %2365 = vmatprep.subr.bf16.mxu1 %v2495_v25  ;;  %v1425_v11 = vpop.xlane.xlu0 %1424 }
 0x390   :  { %2371 = vmatprep.subr.bf16.mxu0 %v2495_v25  ;;  %2455 = vrcp.f32 %v1425_v11 }
 0x392   :  { %v2452_v38 = vpop.eup %2451 }
 0x393   :  { %v1445_v40 = vmul.f32 %v2452_v38, %v2784_v47  ;;  %v501_v47 = vcombine.low %v2564_v23, %v152_v10  ;;  %v146_v16 = vpop.permute.xlu0 %145 }
 0x395   :  { %v1453_v3 = vpack.c.bf16 %v1445_v40, %v1445_v40  ;;  %v509_v24 = vrot.slane %v501_v47, %v2601_v37 }
 0x396   :  { %v2454_v4 = vpop.eup %2453 }
 0x397   :  { %v1446_v26 = vmul.f32 %v2454_v4, %v2794_v7  ;;  %2356 = vmatmul.mubr.msk.bf16.vlgmr.msra.gmra.mrb[20].mxu1 %vm1362_vm3, %v1453_v3 }
 0x398   :  { %2367 = vmatprep.mubr.msk.bf16.mxu1 %vm2496_vm1, %v2495_v25 }
 0x399   :  { %v1454_v9 = vpack.c.bf16 %v1446_v26, %v1446_v26 }
 0x39a   :  { %v2456_v54 = vpop.eup %2455 }
 0x39b   :  { %2362 = vmatmul.mubr.msk.bf16.vlgmr.msra.gmra.mrb[24].mxu0 %vm1362_vm3, %v1454_v9  ;;  %v1447_v14 = vmul.f32 %v2456_v54, %v2800_v58 }
 0x39c   :  { %2373 = vmatprep.mubr.msk.bf16.mxu0 %vm2496_vm1, %v2495_v25 }
 0x39d   :  { %v1455_v40 = vpack.c.bf16 %v1447_v14, %v1447_v14 }
 0x3bc   :  { %v1428_v12 = vpop.xlane.xlu1 %1427 }
 0x3bd   :  { %2457 = vrcp.f32 %v1428_v12 }
 0x3c0   :  { %v158_v7 = vpop.permute.xlu1 %157 }
 0x3c1   :  { %v517_v17 = vcombine.low %v146_v16, %v158_v7  ;;  %v518_v19 = vcombine.high %v146_v16, %v158_v7 }
 0x3c3   :  { %v525_v21 = vrot.slane %v517_v17, %v2601_v37  ;;  %v532_v22 = vrot.slane %v518_v19, %v2601_v37 }
 0x3c4   :  { %v1431_v6 = vpop.xlane.xlu0 %1430 }
 0x3c5   :  { %v533_v27 = vcombine.low %v509_v24, %v525_v21  ;;  %v534_v18 = vcombine.high %v509_v24, %v525_v21  ;;  %v549_v28 = vcombine.low %v516_v20, %v532_v22  ;;  %v550_v29 = vcombine.high %v516_v20, %v532_v22 }
 0x3c6   :  { %2459 = vrcp.f32 %v1431_v6 }
 0x3c7   :  { %v541_v23 = vrot.slane %v533_v27, %v2603_v44  ;;  %v548_v30 = vrot.slane %v534_v18, %v2603_v44  ;;  %v557_v31 = vrot.slane %v549_v28, %v2603_v44  ;;  %v564_v32 = vrot.slane %v550_v29, %v2603_v44  ;;  %v2458_v56 = vpop.eup %2457 }
 0x3c8   :  { %v1448_v49 = vmul.f32 %v2458_v56, %v2832_v8 }
 0x3c9   :  { %v909_v33 = vcombine.low %v541_v23, %v548_v30  ;;  %v2232_v34 = vcombine.high %v541_v23, %v548_v30  ;;  %v925_v35 = vcombine.low %v557_v31, %v564_v32  ;;  %v2233_v36 = vcombine.high %v557_v31, %v564_v32  ;;  %v29_v23 = vld [vmem:[%s3021_s2 + $0x8] sm:$0xff]  ;;  %v30_v30 = vld [vmem:[%s3021_s2 + $0x10] sm:$0xff] }
 0x3ca   :  { %v1456_v3 = vpack.c.bf16 %v1448_v49, %v1448_v49 }
 0x3cb   :  { %v916_v39 = vrot.slane %v909_v33, %v2601_v37  ;;  %v924_v41 = vrot.slane %v2232_v34, %v2601_v37  ;;  %v932_v42 = vrot.slane %v925_v35, %v2601_v37  ;;  %v940_v5 = vrot.slane %v2233_v36, %v2601_v37  ;;  %v31_v33 = vld [vmem:[%s3021_s2 + $0x18] sm:$0xff] }
 0x3cd   :  { %v941_v43 = vcombine.low %v916_v39, %v924_v41  ;;  %v957_v45 = vcombine.low %v932_v42, %v940_v5  ;;  %v942_v50 = vcombine.high %v916_v39, %v924_v41  ;;  %v958_v52 = vcombine.high %v932_v42, %v940_v5 }
 0x3ce   :  { %v2141_v41 = vpack.c.bf16 %v31_v33, %v30_v30 }
 0x3cf   :  { %v949_v0 = vrot.slane %v941_v43, %v2603_v44  ;;  %v965_v46 = vrot.slane %v957_v45, %v2603_v44  ;;  %v956_v48 = vrot.slane %v942_v50, %v2603_v44  ;;  %v972_v55 = vrot.slane %v958_v52, %v2603_v44 }
 0x3d0   :  { %v2460_v4 = vpop.eup %2459 }
 0x3d1   :  { %v973_v57 = vcombine.low %v949_v0, %v965_v46  ;;  %v974_v59 = vcombine.high %v949_v0, %v965_v46  ;;  %v975_v60 = vcombine.low %v956_v48, %v972_v55  ;;  %v976_v61 = vcombine.high %v956_v48, %v972_v55 }
 0x3d2   :  { %v1449_v26 = vmul.f32 %v2460_v4, %v2836_v53 }
 0x3d3   :  { %v1463_v51 = vpack.c.bf16 %v973_v57, %v973_v57  ;;  %v1464_v62 = vpack.c.bf16 %v974_v59, %v974_v59  ;;  %v1465_v2 = vpack.c.bf16 %v975_v60, %v975_v60  ;;  %v1466_v38 = vpack.c.bf16 %v976_v61, %v976_v61 }
 0x3d4   :  { %v1457_v9 = vpack.c.bf16 %v1449_v26, %v1449_v26 }
 0x3d5   :  { %v1656_v63 = vsel %vm1470_vm4, %v1463_v51, 0  ;;  %v1702_v1 = vsel %vm1470_vm4, %v1464_v62, 0  ;;  %v1748_v58 = vsel %vm1470_vm4, %v1465_v2, 0  ;;  %v1794_v8 = vsel %vm1470_vm4, %v1466_v38, 0 }
 0x3d6   :  { %2366 = vmatpush3.bf16.msra.mxu1 %v1656_v63  ;;  %2372 = vmatpush3.bf16.msra.mxu0 %v1702_v1 }
 0x3d7   :  { %2377 = vmatprep.subr.bf16.mxu1 %v2495_v25  ;;  %2383 = vmatprep.subr.bf16.mxu0 %v2495_v25 }
 0x3d9   :  { %2368 = vmatmul.mubr.msk.bf16.vlgmr.msra.gmra.mrb[24].mxu1 %vm1362_vm3, %v1455_v40  ;;  %2374 = vmatmul.mubr.msk.bf16.vlgmr.msra.gmra.mrb[28].mxu0 %vm1362_vm3, %v1456_v3 }
 0x3da   :  { %2378 = vmatpush3.bf16.msra.mxu1 %v1748_v58  ;;  %2384 = vmatpush3.bf16.msra.mxu0 %v1794_v8 }
 0x3db   :  { %2379 = vmatprep.mubr.msk.bf16.mxu1 %vm2496_vm1, %v2495_v25  ;;  %2385 = vmatprep.mubr.msk.bf16.mxu0 %vm2496_vm1, %v2495_v25 }
 0x3dc   :  { %2389 = vmatprep.subr.bf16.mxu1 %v2495_v25 }
 0x3e1   :  { %2380 = vmatmul.mubr.msk.bf16.vlgmr.msra.gmra.mrb[28].mxu1 %vm1362_vm3, %v1457_v9 }
 0x3e2   :  { %2397 = vmatprep.mubr.msk.bf16.mxu1 %vm2496_vm1, %v2495_v25 }
 0x3f1   :  { %v1434_v10 = vpop.xlane.xlu1 %1433 }
 0x3f2   :  { %2461 = vrcp.f32 %v1434_v10 }
 0x3fc   :  { %v2462_v11 = vpop.eup %2461 }
 0x3fd   :  { %v1450_v12 = vmul.f32 %v2462_v11, %v2845_v13  ;;  %v28_v13 = vld [vmem:[%s3021_s2] sm:$0xff] }
 0x3fe   :  { %v2140_v32 = vpack.c.bf16 %v29_v23, %v28_v13 }
 0x3ff   :  { %v1458_v53 = vpack.c.bf16 %v1450_v12, %v1450_v12 }
 0x400   :  { %2390 = vmatpush3.bf16.msra.mxu1 %v2140_v32 }
 0x401   :  { %2386 = vmatmul.mubr.msk.bf16.vlgmr.msra.gmra.mrb[32].mxu0 %vm1362_vm3, %v1458_v53  ;;  %2391 = vmatprep.subr.bf16.mxu1 %v2495_v25 }
 0x404   :  { %2392 = vmatpush3.bf16.msra.mxu1 %v2141_v41 }
 0x405   :  { %2393 = vmatprep.subr.bf16.mxu1 %v2495_v25 }
 0x45f   :  { %v1554_v47 = vpop.f32.mrb[20].mxu0 }
 0x460   :  { %v1508_v15 = vpop.f32.mrb[16].mxu1  ;;  %v2351_v16 = vpop.f32.mrb[21].mxu0 }
 0x461   :  { %v2345_v7 = vpop.f32.mrb[17].mxu1  ;;  %v1557_v17 = vpop.f32.mrb[22].mxu0 }
 0x462   :  { %v1511_v19 = vpop.f32.mrb[18].mxu1  ;;  %v2352_v24 = vpop.f32.mrb[23].mxu0 }
 0x463   :  { %v2346_v20 = vpop.f32.mrb[19].mxu1 }
 0x46a   :  { %v1600_v21 = vpop.f32.mrb[20].mxu1 }
 0x46b   :  { %v1836_v22 = vcombine.low %v1508_v15, %v1600_v21  ;;  %v1837_v27 = vcombine.high %v1508_v15, %v1600_v21  ;;  %v2357_v18 = vpop.f32.mrb[21].mxu1 }
 0x46c   :  { %v1603_v28 = vpop.f32.mrb[22].mxu1 }
 0x46d   :  { %v2358_v29 = vpop.f32.mrb[23].mxu1  ;;  %v1844_v42 = vrot.slane %v1836_v22, %v2601_v37  ;;  %v1851_v5 = vrot.slane %v1837_v27, %v2601_v37 }
 0x46e   :  { %v1646_v31 = vpop.f32.mrb[24].mxu0 }
 0x46f   :  { %v1852_v34 = vcombine.low %v1554_v47, %v1646_v31  ;;  %v1853_v35 = vcombine.high %v1554_v47, %v1646_v31  ;;  %v2363_v36 = vpop.f32.mrb[25].mxu0 }
 0x470   :  { %v1649_v39 = vpop.f32.mrb[26].mxu0 }
 0x471   :  { %v1860_v6 = vrot.slane %v1852_v34, %v2601_v37  ;;  %v1867_v43 = vrot.slane %v1853_v35, %v2601_v37  ;;  %v2364_v45 = vpop.f32.mrb[27].mxu0 }
 0x473   :  { %v1868_v50 = vcombine.low %v1844_v42, %v1860_v6  ;;  %v1869_v52 = vcombine.high %v1844_v42, %v1860_v6  ;;  %v1884_v54 = vcombine.low %v1851_v5, %v1867_v43  ;;  %v1885_v0 = vcombine.high %v1851_v5, %v1867_v43 }
 0x475   :  { %v1876_v46 = vrot.slane %v1868_v50, %v2603_v44  ;;  %v1883_v48 = vrot.slane %v1869_v52, %v2603_v44  ;;  %v1892_v55 = vrot.slane %v1884_v54, %v2603_v44  ;;  %v1899_v56 = vrot.slane %v1885_v0, %v2603_v44  ;;  %v32_v0 = vld [vmem:[%s3021_s2 + $0x20] sm:$0xff] }
 0x477   :  { %v1972_v57 = vcombine.low %v1876_v46, %v1883_v48  ;;  %v2250_v59 = vcombine.high %v1876_v46, %v1883_v48  ;;  %v1988_v60 = vcombine.low %v1892_v55, %v1899_v56  ;;  %v2251_v61 = vcombine.high %v1892_v55, %v1899_v56  ;;  %v33_v46 = vld [vmem:[%s3021_s2 + $0x28] sm:$0xff] }
 0x479   :  { %v1979_v14 = vrot.slane %v1972_v57, %v2601_v37  ;;  %v1987_v49 = vrot.slane %v2250_v59, %v2601_v37  ;;  %v1995_v51 = vrot.slane %v1988_v60, %v2601_v37  ;;  %v2003_v62 = vrot.slane %v2251_v61, %v2601_v37 }
 0x47a   :  { %v2142_v59 = vpack.c.bf16 %v33_v46, %v32_v0 }
 0x47b   :  { %v2005_v63 = vcombine.high %v1979_v14, %v1987_v49  ;;  %v2021_v1 = vcombine.high %v1995_v51, %v2003_v62  ;;  %v2004_v2 = vcombine.low %v1979_v14, %v1987_v49  ;;  %v2020_v38 = vcombine.low %v1995_v51, %v2003_v62 }
 0x47c   :  { %2394 = vmatpush3.bf16.msra.mxu1 %v2142_v59 }
 0x47d   :  { %v2935_v40 = vrot.slane %v2005_v63, %v2603_v44  ;;  %v2938_v3 = vrot.slane %v2021_v1, %v2603_v44  ;;  %v2941_v4 = vrot.slane %v2004_v2, %v2603_v44  ;;  %v2944_v58 = vrot.slane %v2020_v38, %v2603_v44  ;;  %2395 = vmatprep.subr.bf16.mxu1 %v2495_v25  ;;  %v35_v2 = vld [vmem:[%s3021_s2 + $0x38] sm:$0xff] }
 0x47f   :  { %v2038_v8 = vcombine.low %v2935_v40, %v2938_v3  ;;  %v2036_v26 = vcombine.low %v2941_v4, %v2944_v58  ;;  %v2037_v9 = vcombine.high %v2941_v4, %v2944_v58  ;;  %v2039_v10 = vcombine.high %v2935_v40, %v2938_v3  ;;  %v2254_v4 = vld [vmem:[%s3021_s2 + $0x40] ss:$0 sm:$0xff] }
 0x4ac   :  { %v1692_v11 = vpop.f32.mrb[24].mxu1  ;;  %v1738_v12 = vpop.f32.mrb[28].mxu0 }
 0x4ad   :  { %v2369_v53 = vpop.f32.mrb[25].mxu1  ;;  %v2375_v47 = vpop.f32.mrb[29].mxu0 }
 0x4ae   :  { %v1695_v15 = vpop.f32.mrb[26].mxu1  ;;  %v1741_v16 = vpop.f32.mrb[30].mxu0 }
 0x4af   :  { %v2370_v7 = vpop.f32.mrb[27].mxu1  ;;  %v2376_v17 = vpop.f32.mrb[31].mxu0 }
 0x4b4   :  { %v1784_v19 = vpop.f32.mrb[28].mxu1 }
 0x4b5   :  { %v1904_v24 = vcombine.low %v1692_v11, %v1784_v19  ;;  %v1905_v20 = vcombine.high %v1692_v11, %v1784_v19  ;;  %v2381_v21 = vpop.f32.mrb[29].mxu1 }
 0x4b6   :  { %v1787_v22 = vpop.f32.mrb[30].mxu1 }
 0x4b7   :  { %v2382_v27 = vpop.f32.mrb[31].mxu1  ;;  %v1912_v30 = vrot.slane %v1904_v24, %v2601_v37  ;;  %v1919_v31 = vrot.slane %v1905_v20, %v2601_v37 }
 0x4d4   :  { %v1830_v18 = vpop.f32.mrb[32].mxu0 }
 0x4d5   :  { %v1920_v28 = vcombine.low %v1738_v12, %v1830_v18  ;;  %v1921_v29 = vcombine.high %v1738_v12, %v1830_v18  ;;  %v2387_v13 = vpop.f32.mrb[33].mxu0 }
 0x4d6   :  { %v1833_v23 = vpop.f32.mrb[34].mxu0 }
 0x4d7   :  { %v1928_v32 = vrot.slane %v1920_v28, %v2601_v37  ;;  %v1935_v33 = vrot.slane %v1921_v29, %v2601_v37  ;;  %v2388_v34 = vpop.f32.mrb[35].mxu0 }
 0x4d9   :  { %v1936_v35 = vcombine.low %v1912_v30, %v1928_v32  ;;  %v1937_v36 = vcombine.high %v1912_v30, %v1928_v32  ;;  %v1952_v39 = vcombine.low %v1919_v31, %v1935_v33  ;;  %v1953_v41 = vcombine.high %v1919_v31, %v1935_v33 }
 0x4db   :  { %v1944_v42 = vrot.slane %v1936_v35, %v2603_v44  ;;  %v1951_v5 = vrot.slane %v1937_v36, %v2603_v44  ;;  %v1960_v6 = vrot.slane %v1952_v39, %v2603_v44  ;;  %v1967_v43 = vrot.slane %v1953_v41, %v2603_v44 }
 0x4dd   :  { %v2040_v45 = vcombine.low %v1944_v42, %v1951_v5  ;;  %v2252_v50 = vcombine.high %v1944_v42, %v1951_v5  ;;  %v2056_v52 = vcombine.low %v1960_v6, %v1967_v43  ;;  %v2253_v54 = vcombine.high %v1960_v6, %v1967_v43 }
 0x4df   :  { %v2047_v48 = vrot.slane %v2040_v45, %v2601_v37  ;;  %v2055_v55 = vrot.slane %v2252_v50, %v2601_v37  ;;  %v2063_v56 = vrot.slane %v2056_v52, %v2601_v37  ;;  %v2071_v57 = vrot.slane %v2253_v54, %v2601_v37  ;;  %v34_v37 = vld [vmem:[%s3021_s2 + $0x30] sm:$0xff] }
 0x4e0   :  { %v2143_v38 = vpack.c.bf16 %v35_v2, %v34_v37 }
 0x4e1   :  { %v2073_v60 = vcombine.high %v2047_v48, %v2055_v55  ;;  %v2089_v61 = vcombine.high %v2063_v56, %v2071_v57  ;;  %v2072_v14 = vcombine.low %v2047_v48, %v2055_v55  ;;  %v2088_v49 = vcombine.low %v2063_v56, %v2071_v57 }
 0x4e2   :  { %2396 = vmatpush3.bf16.msra.mxu1 %v2143_v38 }
 0x4e3   :  { %v2087_v51 = vrot.slane %v2073_v60, %v2603_v44  ;;  %v2103_v62 = vrot.slane %v2089_v61, %v2603_v44  ;;  %v2080_v63 = vrot.slane %v2072_v14, %v2603_v44  ;;  %v2096_v1 = vrot.slane %v2088_v49, %v2603_v44 }
 0x4e5   :  { %v2106_v11 = vcombine.low %v2087_v51, %v2103_v62  ;;  %v2105_v12 = vcombine.high %v2080_v63, %v2096_v1  ;;  %v2104_v53 = vcombine.low %v2080_v63, %v2096_v1  ;;  %v2107_v47 = vcombine.high %v2087_v51, %v2103_v62 }
 0x4e7   :  { %v2421_v44 = vpack.i.bf16 %v2106_v11, %v2038_v8  ;;  %v2416_v25 = vpack.i.bf16 %v2105_v12, %v2037_v9  ;;  %v2426_v15 = vpack.i.bf16 %v2107_v47, %v2039_v10 }
 0x4e9   :  { %2422 = vrot.lane.b32.xlu1 %v2421_v44, %s2488_s0  ;;  %2417 = vrot.lane.b32.xlu0 %v2416_v25, %s2490_s10 }
 0x4ed   :  { %2427 = vrot.lane.b32.xlu0 %v2426_v15, %s2491_s11 }
 0x55b   :  { %v2423_v16 = vpop.permute.xlu1 %2422  ;;  %v2418_v7 = vpop.permute.xlu0 %2417 }
 0x55c   :  { %v2420_v17 = vunpack.i.h.bf16 %v2418_v7  ;;  %v2419_v19 = vunpack.i.l.bf16 %v2418_v7  ;;  %v2425_v24 = vunpack.i.h.bf16 %v2423_v16  ;;  %v2424_v8 = vunpack.i.l.bf16 %v2423_v16 }
 0x55e   :  { %v2132_v9 = vsel %vm993_vm2, %v2036_v26, %v2419_v19  ;;  %v2133_v40 = vsel %vm993_vm2, %v2104_v53, %v2420_v17 }
 0x55f   :  { %v2428_v3 = vpop.permute.xlu0 %2427  ;;  %v2134_v21 = vsel %vm50_vm0, %v2132_v9, %v2424_v8  ;;  %v2135_v22 = vsel %vm50_vm0, %v2133_v40, %v2425_v24 }
 0x560   :  { %v2430_v10 = vunpack.i.h.bf16 %v2428_v3  ;;  %v2429_v20 = vunpack.i.l.bf16 %v2428_v3 }
 0x562   :  { %v2137_v27 = vsel %vm2136_vm5, %v2134_v21, %v2429_v20  ;;  %v2138_v18 = vsel %vm2136_vm5, %v2135_v22, %v2430_v10 }
 0x563   :  { %v2139_v28 = vpack.c.bf16 %v2138_v18, %v2137_v27 }
 0x565   :  { %2398 = vmatmul.mubr.msk.bf16.vlgmr.msra.gmra.mrb[32].mxu1 %vm2148_vm6, %v2139_v28 }
 0x638   :  { %v2186_v58 = vpop.f32.mrb[32].mxu1 }
 0x639   :  { %v2187_v26 = vadd.f32 %v2254_v4, %v2186_v58  ;;  %v2399_v29 = vpop.f32.mrb[33].mxu1 }
 0x63a   :  { %v2189_v13 = vpop.f32.mrb[34].mxu1 }
 0x63b   :  { %2193 = vst.msk [vmem:[#allocation2] sm:$0xff] %vm50_vm0, %v2187_v26  ;;  %v2190_v23 = vadd.f32 %v2254_v4, %v2189_v13  ;;  %v2400_v30 = vpop.f32.mrb[35].mxu1 }
 0x63d   :  { %2194 = vst.msk [vmem:[#allocation2 + $0x8] sm:$0xff] %vm50_vm0, %v2190_v23 }
 0x63e   :  { %2474 = shalt.err (!%p2471_p4)
}
 0x63f   :  { %s2475_s0 = scalar_lea.hbm %s3022_s3, 256 }
 0x640   :  { %p2476_p5 = scmp.ne.s32.totalorder %s3022_s3, %s2475_s0  ;;  %p2479_p6 = scmp.lt.u32.totalorder %s2475_s0, %s3022_s3 }
 0x642   :  { %p2481_p7 = pnand %p2479_p6, %p2476_p5 }
 0x644   :  { %2484 = shalt.err (!%p2481_p7)
}
 0x645   :  { %s2500_s1 = smov 128   ;;  %s2501_s13 = smov 8  }
 0x646   :  { %2206 = dma.vmem_to_hbm [thread:$0]  %s2201_s6, 256, %s3022_s3, [#allocation3], %s2500_s1, %s2500_s1, %s2501_s13  }
 0x647   :  { %2485 = dma.done.wait [#allocation3], 256  }
 0x648   :  { %2486 = vsyncadd [#allocation3], 4294967040 }
 0x649   :  { %2210 = vsyncpa [#allocation3], 1 }

</bundles_post_ra>
